<compile_context>
chip_gen: v7x
topology: tpu7x:2x2x1
jax: 0.10.0
libtpu: 0.0.40
codegen_flags: <defaults>
</compile_context>

<pallas_src>
import functools

import jax
import jax.numpy as jnp
from jax import lax
from jax.experimental import pallas as pl
from jax.experimental.pallas import tpu as pltpu

_PAIRWISE_EPS = 1e-6  # matches torch F.pairwise_distance default eps


def _round_up(x, m):
    return ((x + m - 1) // m) * m


def _pick_tile(full, unit, max_tile):
    """Largest tile (multiple of `unit`, <= max_tile) dividing round_up(full, unit)."""
    padded = _round_up(full, unit)
    tile = min(_round_up(max_tile, unit), padded)
    tile = (tile // unit) * unit
    while padded % tile != 0:
        tile -= unit
    return tile, padded


def _contrastive_loss_kernel(label_ref, o1_ref, o2_ref, out_ref, sq_acc,
                             *, margin, d_real, td, mask_cols):
    # label_ref : SMEM (1,) f32 scalar label
    # o1_ref/o2_ref : VMEM (TB, TD) feature tiles
    # out_ref   : VMEM (TB, 128) per-example loss (broadcast across lanes)
    # sq_acc    : VMEM (TB, 1) f32 running sum-of-squares over D
    k = pl.program_id(1)
    nk = pl.num_programs(1)

    @pl.when(k == 0)
    def _init():
        sq_acc[...] = jnp.zeros_like(sq_acc)

    o1 = o1_ref[...].astype(jnp.float32)
    o2 = o2_ref[...].astype(jnp.float32)

    if mask_cols:
        # eps only on real columns: zero-padded columns must contribute 0.
        col = k * td + lax.broadcasted_iota(jnp.int32, o1.shape, 1)
        eps = jnp.where(col < d_real, _PAIRWISE_EPS, 0.0)
        diff = (o1 - o2) + eps
    else:
        diff = (o1 - o2) + _PAIRWISE_EPS

    sq_acc[...] += jnp.sum(diff * diff, axis=-1, keepdims=True)   # (TB, 1)

    @pl.when(k == nk - 1)
    def _finalize():
        sq = sq_acc[...]                                          # (TB, 1)
        label = label_ref[0]
        dist = jnp.sqrt(sq)                                       # EUP
        hinge = jnp.maximum(margin - dist, 0.0)
        # same-class term uses sq directly (== dist**2, no roundtrip)
        per_ex = (1.0 - label) * sq + label * (hinge * hinge)     # (TB, 1)
        out_ref[...] = jnp.broadcast_to(per_ex, out_ref.shape)    # lane-dense vst


def contrastive_loss(output1, output2, label, margin=1.0,
                     block_rows=256, block_cols=2048):
    """Pallas TPU implementation of ContrastiveLoss.forward.

    output1, output2: (B, D) arrays.  label: python float / 0-d array
    (0 = same class, 1 = different class).  Returns a scalar f32 loss.
    """
    assert output1.shape == output2.shape and output1.ndim == 2
    B, D = output1.shape

    sub = 16 if output1.dtype == jnp.bfloat16 else 8   # sublane packing
    tb, b_pad = _pick_tile(B, sub, block_rows)
    td, d_pad = _pick_tile(D, 128, block_cols)

    if (b_pad, d_pad) != (B, D):
        pad = ((0, b_pad - B), (0, d_pad - D))
        output1 = jnp.pad(output1, pad)
        output2 = jnp.pad(output2, pad)

    label_arr = jnp.asarray(label, dtype=jnp.float32).reshape((1,))

    kernel = functools.partial(
        _contrastive_loss_kernel,
        margin=float(margin), d_real=D, td=td, mask_cols=(d_pad != D),
    )

    grid = (b_pad // tb, d_pad // td)

    per_example = pl.pallas_call(
        kernel,
        out_shape=jax.ShapeDtypeStruct((b_pad, 128), jnp.float32),
        grid_spec=pltpu.PrefetchScalarGridSpec(
            num_scalar_prefetch=0,
            grid=grid,
            in_specs=[
                pl.BlockSpec(memory_space=pltpu.SMEM),         # label scalar
                pl.BlockSpec((tb, td), lambda i, k: (i, k)),   # output1 tile
                pl.BlockSpec((tb, td), lambda i, k: (i, k)),   # output2 tile
            ],
            out_specs=pl.BlockSpec((tb, 128), lambda i, k: (i, 0)),
            scratch_shapes=[pltpu.VMEM((tb, 1), jnp.float32)],
        ),
        compiler_params=pltpu.CompilerParams(
            dimension_semantics=("parallel", "arbitrary"),
            vmem_limit_bytes=32 * 1024 * 1024,
        ),
    )(label_arr, output1, output2)

    # Tiny final reduce over the real batch rows in XLA.
    return jnp.mean(per_example[:B, 0])


def _reference_contrastive_loss(output1, output2, label, margin=1.0):
    # Pure-JAX reference mirroring the PyTorch module.
    d = jnp.sqrt(
        jnp.sum((output1.astype(jnp.float32) - output2.astype(jnp.float32)
                 + _PAIRWISE_EPS) ** 2, axis=-1))
    return jnp.mean((1.0 - label) * d ** 2
                    + label * jnp.clip(margin - d, 0.0, None) ** 2)


if __name__ == "__main__":
    key = jax.random.PRNGKey(0)
    k1, k2, k3, k4 = jax.random.split(key, 4)

    # Siamese subnetwork embeddings: small batch of D-dim feature vectors.
    B, D = 8, 32
    o1 = jax.random.normal(k1, (B, D), dtype=jnp.float32)
    o2 = jax.random.normal(k2, (B, D), dtype=jnp.float32)

    for label in (1.0, 0.0):   # different-class and same-class branches
        loss = contrastive_loss(o1, o2, label, margin=1.0)
        jax.block_until_ready(loss)
        ref = _reference_contrastive_loss(o1, o2, label, margin=1.0)
        assert jnp.allclose(loss, ref, rtol=1e-5, atol=1e-5), (label, loss, ref)

    # Multi-tile path: >1 grid step along both the batch axis and the D
    # reduction axis, exercising the scratch accumulator + pipeline.
    B2, D2 = 16, 256
    a1 = jax.random.normal(k3, (B2, D2), dtype=jnp.float32)
    a2 = jax.random.normal(k4, (B2, D2), dtype=jnp.float32)
    loss2 = contrastive_loss(a1, a2, 1.0, margin=2.0,
                             block_rows=8, block_cols=128)
    jax.block_until_ready(loss2)
    ref2 = _reference_contrastive_loss(a1, a2, 1.0, margin=2.0)
    assert jnp.allclose(loss2, ref2, rtol=1e-5, atol=1e-5), (loss2, ref2)

    # TODO(synk): module spec passes a scalar `label`; per-example (B,) labels
    # would need a vector label input broadcast in the finalize step.
    print("KERNEL_OK")
</pallas_src>

<mosaic_0001>
module attributes {stable_mosaic.version = 11 : i64} {
  func.func @_contrastive_loss_kernel(%arg0: i32, %arg1: i32, %arg2: memref<1xf32, #tpu.memory_space<smem>>, %arg3: memref<8x128xf32, #tpu.memory_space<vmem>>, %arg4: memref<8x128xf32, #tpu.memory_space<vmem>>, %arg5: memref<8x128xf32, #tpu.memory_space<vmem>>, %arg6: memref<8x1xf32, #tpu.memory_space<vmem>>) attributes {dimension_semantics = [#tpu.dimension_semantics<parallel>, #tpu.dimension_semantics<arbitrary>], iteration_bounds = array<i64: 1, 1>, scalar_prefetch = 0 : i64, scratch_operands = 1 : i64, tpu.core_type = #tpu.core_type<tc>, window_params = [{transform_indices = @transform_0, window_bounds = array<i64: 1>}, {transform_indices = @transform_1, window_bounds = array<i64: 8, 128>}, {transform_indices = @transform_2, window_bounds = array<i64: 8, 128>}, {transform_indices = @transform_3, window_bounds = array<i64: 8, 128>}]} {
    %c0_i32 = arith.constant 0 : i32
    %0 = arith.cmpi eq, %arg1, %c0_i32 : i32
    %1 = arith.extui %0 : i1 to i32
    %c0_i32_0 = arith.constant 0 : i32
    %2 = arith.cmpi ne, %1, %c0_i32_0 : i32
    scf.if %2 {
      %cst_12 = arith.constant 0.000000e+00 : f32
      %25 = vector.broadcast %cst_12 : f32 to vector<8x1xf32>
      %c0_13 = arith.constant 0 : index
      %c0_14 = arith.constant 0 : index
      %26 = vector.load %arg6[%c0_13, %c0_14] : memref<8x1xf32, #tpu.memory_space<vmem>>, vector<8x1xf32>
      tpu.vector_store %arg6[%c0_13, %c0_14], %25 {strides = array<i32>} : memref<8x1xf32, #tpu.memory_space<vmem>>, vector<8x1xf32>,
    } else {
    }
    %c0 = arith.constant 0 : index
    %c0_1 = arith.constant 0 : index
    %3 = vector.load %arg3[%c0, %c0_1] : memref<8x128xf32, #tpu.memory_space<vmem>>, vector<8x128xf32>
    %c0_2 = arith.constant 0 : index
    %c0_3 = arith.constant 0 : index
    %4 = vector.load %arg4[%c0_2, %c0_3] : memref<8x128xf32, #tpu.memory_space<vmem>>, vector<8x128xf32>
    %c128_i32 = arith.constant 128 : i32
    %5 = arith.muli %arg1, %c128_i32 : i32
    %6 = tpu.iota {dimensions = array<i32: 1>} : vector<8x128xi32>
    %7 = vector.broadcast %5 : i32 to vector<8x128xi32>
    %8 = arith.addi %7, %6 : vector<8x128xi32>
    %c32_i32 = arith.constant 32 : i32
    %9 = vector.broadcast %c32_i32 : i32 to vector<8x128xi32>
    %10 = arith.cmpi slt, %8, %9 : vector<8x128xi32>
    %cst = arith.constant 9.99999997E-7 : f32
    %cst_4 = arith.constant 0.000000e+00 : f32
    %11 = vector.broadcast %cst : f32 to vector<8x128xf32>
    %12 = vector.broadcast %cst_4 : f32 to vector<8x128xf32>
    %13 = arith.select %10, %11, %12 : vector<8x128xi1>, vector<8x128xf32>
    %14 = arith.subf %3, %4 : vector<8x128xf32>
    %15 = arith.addf %14, %13 : vector<8x128xf32>
    %c0_5 = arith.constant 0 : index
    %c0_6 = arith.constant 0 : index
    %16 = vector.load %arg6[%c0_5, %c0_6] : memref<8x1xf32, #tpu.memory_space<vmem>>, vector<8x1xf32>
    %17 = arith.mulf %15, %15 : vector<8x128xf32>
    %cst_7 = arith.constant dense<0.000000e+00> : vector<8xf32>
    %18 = vector.multi_reduction <add>, %17, %cst_7 [1] : vector<8x128xf32> to vector<8xf32>
    %19 = vector.shape_cast %18 : vector<8xf32> to vector<8x1xf32>
    %20 = arith.addf %16, %19 : vector<8x1xf32>
    %c0_8 = arith.constant 0 : index
    %c0_9 = arith.constant 0 : index
    %21 = vector.load %arg6[%c0_8, %c0_9] : memref<8x1xf32, #tpu.memory_space<vmem>>, vector<8x1xf32>
    tpu.vector_store %arg6[%c0_8, %c0_9], %20 {strides = array<i32>} : memref<8x1xf32, #tpu.memory_space<vmem>>, vector<8x1xf32>,
    %c0_i32_10 = arith.constant 0 : i32
    %22 = arith.cmpi eq, %arg1, %c0_i32_10 : i32
    %23 = arith.extui %22 : i1 to i32
    %c0_i32_11 = arith.constant 0 : i32
    %24 = arith.cmpi ne, %23, %c0_i32_11 : i32
    scf.if %24 {
      %c0_12 = arith.constant 0 : index
      %c0_13 = arith.constant 0 : index
      %25 = vector.load %arg6[%c0_12, %c0_13] : memref<8x1xf32, #tpu.memory_space<vmem>>, vector<8x1xf32>
      %c0_14 = arith.constant 0 : index
      %26 = memref.load %arg2[%c0_14] : memref<1xf32, #tpu.memory_space<smem>>
      %27 = math.sqrt %25 : vector<8x1xf32>
      %cst_15 = arith.constant 1.000000e+00 : f32
      %28 = vector.broadcast %cst_15 : f32 to vector<8x1xf32>
      %29 = arith.subf %28, %27 : vector<8x1xf32>
      %cst_16 = arith.constant 0.000000e+00 : f32
      %30 = vector.broadcast %cst_16 : f32 to vector<8x1xf32>
      %31 = arith.maximumf %29, %30 : vector<8x1xf32>
      %cst_17 = arith.constant 1.000000e+00 : f32
      %32 = arith.subf %cst_17, %26 : f32
      %33 = vector.broadcast %32 : f32 to vector<8x1xf32>
      %34 = arith.mulf %33, %25 : vector<8x1xf32>
      %35 = arith.mulf %31, %31 : vector<8x1xf32>
      %36 = vector.broadcast %26 : f32 to vector<8x1xf32>
      %37 = arith.mulf %36, %35 : vector<8x1xf32>
      %38 = arith.addf %34, %37 : vector<8x1xf32>
      %39 = vector.shape_cast %38 : vector<8x1xf32> to vector<8x1xf32>
      %40 = vector.broadcast %39 : vector<8x1xf32> to vector<8x128xf32>
      %c0_18 = arith.constant 0 : index
      %c0_19 = arith.constant 0 : index
      %41 = vector.load %arg5[%c0_18, %c0_19] : memref<8x128xf32, #tpu.memory_space<vmem>>, vector<8x128xf32>
      tpu.vector_store %arg5[%c0_18, %c0_19], %40 {strides = array<i32>} : memref<8x128xf32, #tpu.memory_space<vmem>>, vector<8x128xf32>,
    } else {
    }
    return
  }
  func.func @transform_0(%arg0: i32, %arg1: i32) -> i32 {
    %c0_i32 = arith.constant 0 : i32
    %c0_i32_0 = arith.constant 0 : i32
    return %c0_i32 : i32
  }
  func.func @transform_1(%arg0: i32, %arg1: i32) -> (i32, i32) {
    %c0_i32 = arith.constant 0 : i32
    return %arg0, %arg1 : i32, i32
  }
  func.func @transform_2(%arg0: i32, %arg1: i32) -> (i32, i32) {
    %c0_i32 = arith.constant 0 : i32
    return %arg0, %arg1 : i32, i32
  }
  func.func @transform_3(%arg0: i32, %arg1: i32) -> (i32, i32) {
    %c0_i32 = arith.constant 0 : i32
    %c0_i32_0 = arith.constant 0 : i32
    return %arg0, %c0_i32 : i32, i32
  }
}

</mosaic_0001>

<bundles_post_ra>
// kernel: tpu_custom_call.1
= control target key start
LH: loop header
LB: loop body
LE: loop exit
PB: predicated region body
PF: predicated region fallthrough
CT: control target
= control target key end

     0   :  { %9 = vsyncpa [#allocation5], 0  ;;  %s256_s0 = inlined_call_operand.<no memory space> [shape: f32[1], index: 0, kind: input, shape index: {}]   ;;  %s257_s1 = inlined_call_operand.hbm [shape: f32[8,128], index: 1, kind: input, shape index: {}]   ;;  %s258_s2 = inlined_call_operand.hbm [shape: f32[8,128], index: 2, kind: input, shape index: {}]   ;;  %s259_s3 = inlined_call_operand.hbm [shape: f32[8,128], index: 3, kind: output, shape index: {}]  }
   0x1   :  { %10 = vsyncpa [#allocation8], 0 }
   0x2   :  { %11 = vsyncpa [#allocation6], 0  ;;  %s187_s12 = smov [#allocation4]   ;;  %s188_s14 = smov [#allocation7]  }
   0x3   :  { %s20_s13 = sshll.u32 %s187_s12, 4  ;;  %s30_s15 = sshll.u32 %s188_s14, 4  ;;  %s21_s13 = int_to_ptr.vmem [resolvable:$true] %s20_s13  ;;  %s31_s15 = int_to_ptr.vmem [resolvable:$true] %s30_s15 }
   0x4   :  { %s115_s18 = scalar_lea.hbm %s257_s1, 128 }
   0x5   :  { %p116_p0 = scmp.ne.s32.totalorder %s257_s1, %s115_s18  ;;  %p119_p1 = scmp.lt.u32.totalorder %s115_s18, %s257_s1 }
   0x7   :  { %p121_p2 = pnand %p119_p1, %p116_p0 }
   0x9   :  { %124 = shalt.err (!%p121_p2)
}
   0xa   :  { %s125_s23 = scalar_lea.vmem %s21_s13, 128  ;;  %p130_p4 = scmp.lt.s32.totalorder %s21_s13, %s21_s13 }
   0xb   :  { %p126_p3 = scmp.ne.s32.totalorder %s21_s13, %s125_s23  ;;  %p131_p5 = scmp.lt.s32.totalorder %s125_s23, %s125_s23 }
   0xd   :  { %p132_p6 = por %p131_p5, %p130_p4 }
   0xf   :  { %p133_p7 = pnand %p132_p6, %p126_p3 }
  0x11   :  { %136 = shalt.err (!%p133_p7)
}
  0x12   :  { %23 = dma.hbm_to_vmem [thread:$0]  %s257_s1, 128, %s21_s13, [#allocation5]  }
  0x13   :  { %s137_s28 = scalar_lea.hbm %s258_s2, 128 }
  0x14   :  { %p138_p8 = scmp.ne.s32.totalorder %s258_s2, %s137_s28  ;;  %p141_p9 = scmp.lt.u32.totalorder %s137_s28, %s258_s2 }
  0x16   :  { %p143_p10 = pnand %p141_p9, %p138_p8 }
  0x18   :  { %146 = shalt.err (!%p143_p10)
}
  0x19   :  { %s147_s6 = scalar_lea.vmem %s31_s15, 128  ;;  %p152_p12 = scmp.lt.s32.totalorder %s31_s15, %s31_s15 }
  0x1a   :  { %p148_p11 = scmp.ne.s32.totalorder %s31_s15, %s147_s6  ;;  %p153_p13 = scmp.lt.s32.totalorder %s147_s6, %s147_s6 }
  0x1c   :  { %p154_p0 = por %p153_p13, %p152_p12 }
  0x1e   :  { %p155_p1 = pnand %p154_p0, %p148_p11 }
  0x20   :  { %158 = shalt.err (!%p155_p1)
}
  0x21   :  { %33 = dma.hbm_to_vmem [thread:$0]  %s258_s2, 128, %s31_s15, [#allocation8]  }
  0x22   :  { %181 = dma.done.wait [#allocation5], 128  }
  0x23   :  { %182 = vsyncadd [#allocation5], 4294967168 }
  0x24   :  { %183 = dma.done.wait [#allocation8], 128  }
  0x25   :  { %184 = vsyncadd [#allocation8], 4294967168  ;;  %vm44_vm0 = vcmask 7168   ;;  %v49_v0 = vlaneseq  ;;  %v189_v1 = vmov 0.0   ;;  %v46_v3 = vld [vmem:[#allocation4] sm:$0xff]  ;;  %v47_v4 = vld [vmem:[#allocation7] sm:$0xff]  ;;  %v82_v22 = vstv %s256_s0 }
  0x26   :  { %45 = vst.msk [vmem:[#allocation2] sm:$0xff] %vm44_vm0, %v189_v1  ;;  %v55_v6 = vsub.f32 %v46_v3, %v47_v4  ;;  %v190_v9 = vmov 0   ;;  %s78_s9 = ssub.f32 1.0, %s256_s0  ;;  %s191_s12 = smov [#allocation9]  }
  0x27   :  { %v50_v2 = vand.u32 127, %v49_v0  ;;  %112 = vset.pattern.permute.xlu0 %v190_v9  ;;  %s97_s13 = sshll.u32 %s191_s12, 4  ;;  %s98_s13 = int_to_ptr.vmem [resolvable:$true] %s97_s13 }
  0x28   :  { %v79_v21 = vstv %s78_s9  ;;  %s159_s14 = scalar_lea.vmem %s98_s13, 128  ;;  %p164_p3 = scmp.lt.s32.totalorder %s98_s13, %s98_s13 }
  0x29   :  { %vm53_vm1 = vcmp.lt.s32.totalorder %v50_v2, 32  ;;  %p160_p2 = scmp.ne.s32.totalorder %s98_s13, %s159_s14  ;;  %p165_p4 = scmp.lt.s32.totalorder %s159_s14, %s159_s14 }
  0x2a   :  { %v54_v5 = vsel %vm53_vm1, 1e-06, %v189_v1 }
  0x2b   :  { %v56_v7 = vadd.f32 %v55_v6, %v54_v5  ;;  %p166_p5 = por %p165_p4, %p164_p3 }
  0x2d   :  { %v58_v8 = vmul.f32 %v56_v7, %v56_v7  ;;  %v57_v10 = vld [vmem:[#allocation2] sm:$0xff]  ;;  %p167_p6 = pnand %p166_p5, %p160_p2 }
  0x2f   :  { %59 = vadd.xlane.f32.xlu0 %v58_v8 }
  0xbc   :  { %v60_v11 = vpop.xlane.xlu0 %59 }
  0xbd   :  { %v61_v12 = vadd.f32 %v60_v11, %v57_v10 }
  0xbf   :  { %63 = vst.msk [vmem:[#allocation2] sm:$0xff] %vm44_vm0, %v61_v12 }
  0xc6   :  { %v67_v13 = vld [vmem:[#allocation2] sm:$0xff] }
  0xc7   :  { %113 = vrsqrt.f32 %v67_v13  ;;  %vm71_vm2 = vcmp.eq.f32.partialorder %v67_v13, inf  ;;  %v74_v16 = vand.u32 2147483648, %v67_v13  ;;  %vm73_vm3 = vcmp.eq.f32.partialorder %v67_v13, 0.0 }
  0xc8   :  { %v80_v24 = vmul.f32 %v79_v21, %v67_v13 }
  0xd1   :  { %v114_v14 = vpop.eup %113 }
  0xd2   :  { %v70_v15 = vmul.f32 %v114_v14, %v67_v13 }
  0xd4   :  { %v72_v17 = vsel %vm71_vm2, %v67_v13, %v70_v15 }
  0xd5   :  { %v75_v18 = vsel %vm73_vm3, %v74_v16, %v72_v17 }
  0xd6   :  { %v76_v19 = vsub.f32 1.0, %v75_v18 }
  0xd8   :  { %v77_v20 = vmax.f32 %v76_v19, 0.0 }
  0xda   :  { %v81_v23 = vmul.f32 %v77_v20, %v77_v20 }
  0xdc   :  { %v83_v25 = vmul.f32 %v82_v22, %v81_v23 }
  0xde   :  { %v84_v26 = vadd.f32 %v83_v25, %v80_v24 }
  0xe0   :  { %87 = vperm.xlu0 %112, %v84_v26  }
 0x15f   :  { %v88_v27 = vpop.permute.xlu0 %87 }
 0x160   :  { %90 = vst [vmem:[#allocation9] sm:$0xff] %v88_v27 }
 0x161   :  { %170 = shalt.err (!%p167_p6)
}
 0x162   :  { %s171_s0 = scalar_lea.hbm %s259_s3, 128 }
 0x163   :  { %p172_p7 = scmp.ne.s32.totalorder %s259_s3, %s171_s0  ;;  %p175_p8 = scmp.lt.u32.totalorder %s171_s0, %s259_s3 }
 0x165   :  { %p177_p9 = pnand %p175_p8, %p172_p7 }
 0x167   :  { %180 = shalt.err (!%p177_p9)
}
 0x168   :  { %100 = dma.vmem_to_hbm [thread:$0]  %s98_s13, 128, %s259_s3, [#allocation6]  }
 0x169   :  { %185 = dma.done.wait [#allocation6], 128  }
 0x16a   :  { %186 = vsyncadd [#allocation6], 4294967168 }
 0x16b   :  { %104 = vsyncpa [#allocation5], 1 }
 0x16c   :  { %105 = vsyncpa [#allocation8], 1 }
 0x16d   :  { %106 = vsyncpa [#allocation6], 1 }

</bundles_post_ra>
